<compile_context>
chip_gen: v7x
topology: tpu7x:2x2x1
jax: 0.10.0
libtpu: 0.0.40
codegen_flags: <defaults>
</compile_context>

<pallas_src>
import functools

import jax
import jax.numpy as jnp
from jax.experimental import pallas as pl
from jax.experimental.pallas import tpu as pltpu

HIDDEN = 256
D_IN = 100
D_OUT = 100
OUT_PAD = 128          # layer-4 lanes padded to one full 128-lane register
MAX_TILE_B = 512       # batch tile (multiple of 8); weights stay VMEM-resident


def _round_up(n, m):
    return ((n + m - 1) // m) * m


def mlp_kernel(x_ref, c_ref, w1x_ref, w23_ref, w4_ref, vec_ref, out_ref):
    """4-layer MLP on one batch tile, entirely in VMEM.

    x_ref:   (TILE_B, 100) f32
    c_ref:   (TILE_B, 1)   f32
    w1x_ref: (100, 256) bf16                  -- W1 rows for x
    w23_ref: (512, 256) bf16                  -- [W2; W3]
    w4_ref:  (256, 128) bf16                  -- W4, cols 100:128 zero
    vec_ref: (5, 256)   f32                   -- [b1; b2; b3; b4(pad,128); w1_c]
    out_ref: (TILE_B, 128) f32                -- cols 100:128 are zero
    """
    x = x_ref[...]
    c = c_ref[...]

    b1 = vec_ref[0:1, :]
    b2 = vec_ref[1:2, :]
    b3 = vec_ref[2:3, :]
    b4 = vec_ref[3:4, 0:OUT_PAD]
    w1c = vec_ref[4:5, :]

    # Layer 1: x @ W1[:100] (MXU, bf16) + condition * W1[100] (VPU rank-1) + b1
    h = jnp.dot(x.astype(jnp.bfloat16), w1x_ref[...],
                preferred_element_type=jnp.float32)
    h = jnp.maximum(h + c * w1c + b1, 0.0)

    # Layer 2
    h = jnp.dot(h.astype(jnp.bfloat16), w23_ref[0:HIDDEN, :],
                preferred_element_type=jnp.float32)
    h = jnp.maximum(h + b2, 0.0)

    # Layer 3
    h = jnp.dot(h.astype(jnp.bfloat16), w23_ref[HIDDEN:2 * HIDDEN, :],
                preferred_element_type=jnp.float32)
    h = jnp.maximum(h + b3, 0.0)

    # Layer 4 (no activation) -- 128 output lanes (full-lane unmasked store)
    out = jnp.dot(h.astype(jnp.bfloat16), w4_ref[...],
                  preferred_element_type=jnp.float32)
    out_ref[...] = out + b4


@jax.jit
def conditioned_denoise_forward(x, condition, w1x, w23, w4p, vec):
    """x: [B,100] f32, condition: [B,1] f32 -> [B,100] f32."""
    B = x.shape[0]

    # Batch tile: multiple of 8 sublanes, capped at MAX_TILE_B; pad B to a
    # whole number of tiles (padded rows are discarded after the call).
    tile_b = min(MAX_TILE_B, _round_up(B, 8))
    b_pad = _round_up(B, tile_b)
    if b_pad != B:
        x = jnp.pad(x, ((0, b_pad - B), (0, 0)))
        condition = jnp.pad(condition, ((0, b_pad - B), (0, 0)))
    grid = (pl.cdiv(b_pad, tile_b),)

    flops = 2 * b_pad * (D_IN * HIDDEN + HIDDEN * HIDDEN + HIDDEN * HIDDEN
                         + HIDDEN * OUT_PAD)
    # Weights counted once (VMEM-resident across batch tiles).
    bytes_accessed = (w1x.size * 2 + w23.size * 2 + w4p.size * 2 + vec.size * 4
                      + x.size * 4 + condition.size * 4 + b_pad * OUT_PAD * 4)

    out_full = pl.pallas_call(
        mlp_kernel,
        out_shape=jax.ShapeDtypeStruct((b_pad, OUT_PAD), jnp.float32),
        grid=grid,
        in_specs=[
            pl.BlockSpec((tile_b, D_IN), lambda i: (i, 0)),        # x
            pl.BlockSpec((tile_b, 1), lambda i: (i, 0)),           # condition
            pl.BlockSpec((D_IN, HIDDEN), lambda i: (0, 0)),        # w1x (resident)
            pl.BlockSpec((2 * HIDDEN, HIDDEN), lambda i: (0, 0)),  # w2;w3 (resident)
            pl.BlockSpec((HIDDEN, OUT_PAD), lambda i: (0, 0)),     # w4 (resident)
            pl.BlockSpec((5, HIDDEN), lambda i: (0, 0)),           # biases + w1_c
        ],
        out_specs=pl.BlockSpec((tile_b, OUT_PAD), lambda i: (i, 0)),
        compiler_params=pltpu.CompilerParams(
            dimension_semantics=("parallel",)),
        cost_estimate=pl.CostEstimate(flops=flops, transcendentals=0,
                                      bytes_accessed=bytes_accessed),
    )(x, condition, w1x, w23, w4p, vec)

    return out_full[:B, :D_OUT]


def init_params(key):
    """PyTorch nn.Linear init: U(-1/sqrt(fan_in), 1/sqrt(fan_in)).

    Weights are stored as (in_features, out_features)."""
    dims = [(101, 256), (256, 256), (256, 256), (256, 100)]
    ws, bs = [], []
    for fan_in, fan_out in dims:
        key, kw, kb = jax.random.split(key, 3)
        bound = 1.0 / jnp.sqrt(jnp.float32(fan_in))
        w = jax.random.uniform(kw, (fan_in, fan_out), jnp.float32,
                               minval=-bound, maxval=bound)
        b = jax.random.uniform(kb, (fan_out,), jnp.float32,
                               minval=-bound, maxval=bound)
        ws.append(w)
        bs.append(b)
    return ws, bs


def pack_params(ws, bs):
    """Pack params into the kernel's coalesced bf16 / f32 operands."""
    w1, w2, w3, w4 = ws
    b1, b2, b3, b4 = bs

    w1x = w1[:D_IN, :].astype(jnp.bfloat16)                          # (100, 256)
    w1c = w1[D_IN, :]                                                # (256,) f32

    w23 = jnp.concatenate([w2, w3], axis=0).astype(jnp.bfloat16)     # (512, 256)

    w4p = jnp.zeros((HIDDEN, OUT_PAD), jnp.float32).at[:, :D_OUT].set(w4)
    w4p = w4p.astype(jnp.bfloat16)                                   # (256, 128)

    b4p = jnp.zeros((HIDDEN,), jnp.float32).at[:D_OUT].set(b4)
    vec = jnp.stack([b1, b2, b3, b4p, w1c], axis=0)                  # (5, 256) f32
    return w1x, w23, w4p, vec


def reference_forward(x, condition, ws, bs):
    """Pure-JAX reference mirroring the kernel's bf16 weight/activation rounding
    (f32 accumulation), so the comparison isolates kernel correctness."""
    def q(a):
        return a.astype(jnp.bfloat16).astype(jnp.float32)

    w1, w2, w3, w4 = ws
    b1, b2, b3, b4 = bs
    h = q(x) @ q(w1[:D_IN]) + condition * w1[D_IN:D_IN + 1] + b1
    h = jnp.maximum(h, 0.0)
    h = jnp.maximum(q(h) @ q(w2) + b2, 0.0)
    h = jnp.maximum(q(h) @ q(w3) + b3, 0.0)
    return q(h) @ q(w4) + b4


if __name__ == "__main__":
    key = jax.random.PRNGKey(0)
    k_params, k_x, k_c, k_x2, k_c2 = jax.random.split(key, 5)

    ws, bs = init_params(k_params)
    w1x, w23, w4p, vec = pack_params(ws, bs)

    # Small primary shape.
    B = 8
    x = jax.random.normal(k_x, (B, D_IN), jnp.float32)
    condition = jax.random.bernoulli(k_c, 0.5, (B, 1)).astype(jnp.float32)

    out = conditioned_denoise_forward(x, condition, w1x, w23, w4p, vec)
    out = jax.block_until_ready(out)
    ref = reference_forward(x, condition, ws, bs)
    assert out.shape == (B, D_OUT)
    assert jnp.allclose(out, ref, atol=1e-2, rtol=1e-2)

    # Second small shape exercising the padded / tail-tile path (B not a
    # multiple of 8).
    B2 = 20
    x2 = jax.random.normal(k_x2, (B2, D_IN), jnp.float32)
    condition2 = jax.random.bernoulli(k_c2, 0.5, (B2, 1)).astype(jnp.float32)

    out2 = conditioned_denoise_forward(x2, condition2, w1x, w23, w4p, vec)
    out2 = jax.block_until_ready(out2)
    ref2 = reference_forward(x2, condition2, ws, bs)
    assert out2.shape == (B2, D_OUT)
    assert jnp.allclose(out2, ref2, atol=1e-2, rtol=1e-2)

    print("KERNEL_OK")
</pallas_src>

<mosaic_0001>
module attributes {stable_mosaic.version = 11 : i64} {
  func.func @mlp_kernel(%arg0: i32, %arg1: memref<8x100xf32, #tpu.memory_space<vmem>>, %arg2: memref<8x1xf32, #tpu.memory_space<vmem>>, %arg3: memref<100x256xbf16, #tpu.memory_space<vmem>>, %arg4: memref<512x256xbf16, #tpu.memory_space<vmem>>, %arg5: memref<256x128xbf16, #tpu.memory_space<vmem>>, %arg6: memref<5x256xf32, #tpu.memory_space<vmem>>, %arg7: memref<8x128xf32, #tpu.memory_space<vmem>>) attributes {dimension_semantics = [#tpu.dimension_semantics<parallel>], iteration_bounds = array<i64: 1>, scalar_prefetch = 0 : i64, scratch_operands = 0 : i64, tpu.core_type = #tpu.core_type<tc>, window_params = [{transform_indices = @transform_0, window_bounds = array<i64: 8, 100>}, {transform_indices = @transform_1, window_bounds = array<i64: 8, 1>}, {pipeline_mode = #tpu.pipeline_mode<synchronous>, transform_indices = @transform_2, window_bounds = array<i64: 100, 256>}, {pipeline_mode = #tpu.pipeline_mode<synchronous>, transform_indices = @transform_3, window_bounds = array<i64: 512, 256>}, {pipeline_mode = #tpu.pipeline_mode<synchronous>, transform_indices = @transform_4, window_bounds = array<i64: 256, 128>}, {pipeline_mode = #tpu.pipeline_mode<synchronous>, transform_indices = @transform_5, window_bounds = array<i64: 5, 256>}, {transform_indices = @transform_6, window_bounds = array<i64: 8, 128>}]} {
    %c0 = arith.constant 0 : index
    %c0_0 = arith.constant 0 : index
    %0 = vector.load %arg1[%c0, %c0_0] : memref<8x100xf32, #tpu.memory_space<vmem>>, vector<8x100xf32>
    %c0_1 = arith.constant 0 : index
    %c0_2 = arith.constant 0 : index
    %1 = vector.load %arg2[%c0_1, %c0_2] : memref<8x1xf32, #tpu.memory_space<vmem>>, vector<8x1xf32>
    %c0_3 = arith.constant 0 : index
    %c0_4 = arith.constant 0 : index
    %2 = vector.load %arg6[%c0_3, %c0_4] : memref<5x256xf32, #tpu.memory_space<vmem>>, vector<1x256xf32>
    %c1 = arith.constant 1 : index
    %c0_5 = arith.constant 0 : index
    %3 = vector.load %arg6[%c1, %c0_5] : memref<5x256xf32, #tpu.memory_space<vmem>>, vector<1x256xf32>
    %c2 = arith.constant 2 : index
    %c0_6 = arith.constant 0 : index
    %4 = vector.load %arg6[%c2, %c0_6] : memref<5x256xf32, #tpu.memory_space<vmem>>, vector<1x256xf32>
    %c3 = arith.constant 3 : index
    %c0_7 = arith.constant 0 : index
    %5 = vector.load %arg6[%c3, %c0_7] : memref<5x256xf32, #tpu.memory_space<vmem>>, vector<1x128xf32>
    %c4 = arith.constant 4 : index
    %c0_8 = arith.constant 0 : index
    %6 = vector.load %arg6[%c4, %c0_8] : memref<5x256xf32, #tpu.memory_space<vmem>>, vector<1x256xf32>
    %7 = arith.truncf %0 : vector<8x100xf32> to vector<8x100xbf16>
    %c0_9 = arith.constant 0 : index
    %c0_10 = arith.constant 0 : index
    %8 = vector.load %arg3[%c0_9, %c0_10] : memref<100x256xbf16, #tpu.memory_space<vmem>>, vector<100x256xbf16>
    %cst = arith.constant dense<0.000000e+00> : vector<8x256xf32>
    %9 = tpu.matmul %7, %8, %cst {dimension_numbers = #tpu.dot_dimension_numbers<[1], [0], [0], [1], [0, 0, 1, 1], [], []>} : vector<8x100xbf16>, vector<100x256xbf16>, vector<8x256xf32> -> vector<8x256xf32>
    %10 = vector.broadcast %1 : vector<8x1xf32> to vector<8x256xf32>
    %11 = vector.broadcast %6 : vector<1x256xf32> to vector<8x256xf32>
    %12 = arith.mulf %10, %11 : vector<8x256xf32>
    %13 = arith.addf %9, %12 : vector<8x256xf32>
    %14 = vector.broadcast %2 : vector<1x256xf32> to vector<8x256xf32>
    %15 = arith.addf %13, %14 : vector<8x256xf32>
    %cst_11 = arith.constant 0.000000e+00 : f32
    %16 = vector.broadcast %cst_11 : f32 to vector<8x256xf32>
    %17 = arith.maximumf %15, %16 : vector<8x256xf32>
    %18 = arith.truncf %17 : vector<8x256xf32> to vector<8x256xbf16>
    %c0_12 = arith.constant 0 : index
    %c0_13 = arith.constant 0 : index
    %19 = vector.load %arg4[%c0_12, %c0_13] : memref<512x256xbf16, #tpu.memory_space<vmem>>, vector<256x256xbf16>
    %cst_14 = arith.constant dense<0.000000e+00> : vector<8x256xf32>
    %20 = tpu.matmul %18, %19, %cst_14 {dimension_numbers = #tpu.dot_dimension_numbers<[1], [0], [0], [1], [0, 0, 1, 1], [], []>} : vector<8x256xbf16>, vector<256x256xbf16>, vector<8x256xf32> -> vector<8x256xf32>
    %21 = vector.broadcast %3 : vector<1x256xf32> to vector<8x256xf32>
    %22 = arith.addf %20, %21 : vector<8x256xf32>
    %cst_15 = arith.constant 0.000000e+00 : f32
    %23 = vector.broadcast %cst_15 : f32 to vector<8x256xf32>
    %24 = arith.maximumf %22, %23 : vector<8x256xf32>
    %25 = arith.truncf %24 : vector<8x256xf32> to vector<8x256xbf16>
    %c256 = arith.constant 256 : index
    %c0_16 = arith.constant 0 : index
    %26 = vector.load %arg4[%c256, %c0_16] : memref<512x256xbf16, #tpu.memory_space<vmem>>, vector<256x256xbf16>
    %cst_17 = arith.constant dense<0.000000e+00> : vector<8x256xf32>
    %27 = tpu.matmul %25, %26, %cst_17 {dimension_numbers = #tpu.dot_dimension_numbers<[1], [0], [0], [1], [0, 0, 1, 1], [], []>} : vector<8x256xbf16>, vector<256x256xbf16>, vector<8x256xf32> -> vector<8x256xf32>
    %28 = vector.broadcast %4 : vector<1x256xf32> to vector<8x256xf32>
    %29 = arith.addf %27, %28 : vector<8x256xf32>
    %cst_18 = arith.constant 0.000000e+00 : f32
    %30 = vector.broadcast %cst_18 : f32 to vector<8x256xf32>
    %31 = arith.maximumf %29, %30 : vector<8x256xf32>
    %32 = arith.truncf %31 : vector<8x256xf32> to vector<8x256xbf16>
    %c0_19 = arith.constant 0 : index
    %c0_20 = arith.constant 0 : index
    %33 = vector.load %arg5[%c0_19, %c0_20] : memref<256x128xbf16, #tpu.memory_space<vmem>>, vector<256x128xbf16>
    %cst_21 = arith.constant dense<0.000000e+00> : vector<8x128xf32>
    %34 = tpu.matmul %32, %33, %cst_21 {dimension_numbers = #tpu.dot_dimension_numbers<[1], [0], [0], [1], [0, 0, 1, 1], [], []>} : vector<8x256xbf16>, vector<256x128xbf16>, vector<8x128xf32> -> vector<8x128xf32>
    %35 = vector.broadcast %5 : vector<1x128xf32> to vector<8x128xf32>
    %36 = arith.addf %34, %35 : vector<8x128xf32>
    %c0_22 = arith.constant 0 : index
    %c0_23 = arith.constant 0 : index
    %37 = vector.load %arg7[%c0_22, %c0_23] : memref<8x128xf32, #tpu.memory_space<vmem>>, vector<8x128xf32>
    tpu.vector_store %arg7[%c0_22, %c0_23], %36 {strides = array<i32>} : memref<8x128xf32, #tpu.memory_space<vmem>>, vector<8x128xf32>,
    return
  }
  func.func @transform_0(%arg0: i32) -> (i32, i32) {
    %c0_i32 = arith.constant 0 : i32
    %c0_i32_0 = arith.constant 0 : i32
    return %arg0, %c0_i32 : i32, i32
  }
  func.func @transform_1(%arg0: i32) -> (i32, i32) {
    %c0_i32 = arith.constant 0 : i32
    %c0_i32_0 = arith.constant 0 : i32
    return %arg0, %c0_i32 : i32, i32
  }
  func.func @transform_2(%arg0: i32) -> (i32, i32) {
    %c0_i32 = arith.constant 0 : i32
    %c0_i32_0 = arith.constant 0 : i32
    %c0_i32_1 = arith.constant 0 : i32
    return %c0_i32, %c0_i32_0 : i32, i32
  }
  func.func @transform_3(%arg0: i32) -> (i32, i32) {
    %c0_i32 = arith.constant 0 : i32
    %c0_i32_0 = arith.constant 0 : i32
    %c0_i32_1 = arith.constant 0 : i32
    return %c0_i32, %c0_i32_0 : i32, i32
  }
  func.func @transform_4(%arg0: i32) -> (i32, i32) {
    %c0_i32 = arith.constant 0 : i32
    %c0_i32_0 = arith.constant 0 : i32
    %c0_i32_1 = arith.constant 0 : i32
    return %c0_i32, %c0_i32_0 : i32, i32
  }
  func.func @transform_5(%arg0: i32) -> (i32, i32) {
    %c0_i32 = arith.constant 0 : i32
    %c0_i32_0 = arith.constant 0 : i32
    %c0_i32_1 = arith.constant 0 : i32
    return %c0_i32, %c0_i32_0 : i32, i32
  }
  func.func @transform_6(%arg0: i32) -> (i32, i32) {
    %c0_i32 = arith.constant 0 : i32
    %c0_i32_0 = arith.constant 0 : i32
    return %arg0, %c0_i32 : i32, i32
  }
}

</mosaic_0001>

<bundles_post_ra>
// kernel: conditioned_denoise_forward.1
= control target key start
LH: loop header
LB: loop body
LE: loop exit
PB: predicated region body
PF: predicated region fallthrough
CT: control target
= control target key end

     0   :  { %11 = vsyncpa [#allocation3], 0  ;;  %s1412_s0 = inlined_call_operand.vmem [shape: f32[8,100], index: 0, kind: input, shape index: {}]   ;;  %s1413_s1 = inlined_call_operand.vmem [shape: f32[8,1], index: 1, kind: input, shape index: {}]   ;;  %s1414_s2 = inlined_call_operand.hbm [shape: bf16[100,256], index: 2, kind: input, shape index: {}]   ;;  %s1415_s3 = inlined_call_operand.hbm [shape: bf16[512,256], index: 3, kind: input, shape index: {}]   ;;  %s1416_s4 = inlined_call_operand.hbm [shape: bf16[256,128], index: 4, kind: input, shape index: {}]   ;;  %s1417_s5 = inlined_call_operand.vmem [shape: f32[5,256], index: 5, kind: input, shape index: {}]   ;;  %s1418_s6 = inlined_call_operand.hbm [shape: f32[8,128], index: 6, kind: output, shape index: {}]  }
   0x1   :  { %12 = vsyncpa [#allocation6], 0 }
   0x2   :  { %13 = vsyncpa [#allocation4], 0  ;;  %s1280_s21 = smov [#allocation5]   ;;  %s1281_s23 = smov [#allocation2]  }
   0x3   :  { %s35_s22 = sshll.u32 %s1280_s21, 4  ;;  %s23_s24 = sshll.u32 %s1281_s23, 4  ;;  %s36_s22 = int_to_ptr.vmem [resolvable:$true] %s35_s22  ;;  %s1324_s24 = int_to_ptr.vmem [resolvable:$true] %s23_s24 }
   0x4   :  { %s1186_s27 = scalar_lea.hbm %s1415_s3, 8192 }
   0x5   :  { %p1187_p0 = scmp.ne.s32.totalorder %s1415_s3, %s1186_s27  ;;  %p1190_p1 = scmp.lt.u32.totalorder %s1186_s27, %s1415_s3 }
   0x7   :  { %p1192_p2 = pnand %p1190_p1, %p1187_p0 }
   0x9   :  { %1195 = shalt.err (!%p1192_p2)
}
   0xa   :  { %s1196_s8 = scalar_lea.vmem %s36_s22, 8192  ;;  %p1201_p4 = scmp.lt.s32.totalorder %s36_s22, %s36_s22 }
   0xb   :  { %p1197_p3 = scmp.ne.s32.totalorder %s36_s22, %s1196_s8  ;;  %p1202_p5 = scmp.lt.s32.totalorder %s1196_s8, %s1196_s8 }
   0xd   :  { %p1203_p6 = por %p1202_p5, %p1201_p4 }
   0xf   :  { %p1204_p7 = pnand %p1203_p6, %p1197_p3 }
  0x11   :  { %1207 = shalt.err (!%p1204_p7)
}
  0x12   :  { %s1282_s9 = smov 128   ;;  %s1283_s10 = smov 8  }
  0x13   :  { %41 = dma.hbm_to_vmem [thread:$0]  %s1415_s3, 8192, %s36_s22, [#allocation6], %s1282_s9, %s1282_s9, %s1283_s10  }
  0x14   :  { %s1208_s15 = scalar_lea.hbm %s1414_s2, 1664 }
  0x15   :  { %p1209_p8 = scmp.ne.s32.totalorder %s1414_s2, %s1208_s15  ;;  %p1212_p9 = scmp.lt.u32.totalorder %s1208_s15, %s1414_s2 }
  0x17   :  { %p1214_p10 = pnand %p1212_p9, %p1209_p8 }
  0x19   :  { %1217 = shalt.err (!%p1214_p10)
}
  0x1a   :  { %s1218_s20 = scalar_lea.vmem %s1324_s24, 1664  ;;  %p1223_p12 = scmp.lt.s32.totalorder %s1324_s24, %s1324_s24 }
  0x1b   :  { %p1219_p11 = scmp.ne.s32.totalorder %s1324_s24, %s1218_s20  ;;  %p1224_p13 = scmp.lt.s32.totalorder %s1218_s20, %s1218_s20 }
  0x1d   :  { %p1225_p0 = por %p1224_p13, %p1223_p12 }
  0x1f   :  { %p1226_p1 = pnand %p1225_p0, %p1219_p11 }
  0x21   :  { %1229 = shalt.err (!%p1226_p1)
}
  0x22   :  { %29 = dma.hbm_to_vmem [thread:$0]  %s1414_s2, 1664, %s1324_s24, [#allocation3], %s1282_s9, %s1282_s9, %s1283_s10  }
  0x23   :  { %s1284_s22 = smov [#allocation7]   ;;  %s1230_s27 = scalar_lea.hbm %s1416_s4, 2048 }
  0x24   :  { %s47_s23 = sshll.u32 %s1284_s22, 4  ;;  %p1231_p2 = scmp.ne.s32.totalorder %s1416_s4, %s1230_s27  ;;  %s48_s23 = int_to_ptr.vmem [resolvable:$true] %s47_s23 }
  0x25   :  { %p1234_p3 = scmp.lt.u32.totalorder %s1230_s27, %s1416_s4 }
  0x27   :  { %p1236_p4 = pnand %p1234_p3, %p1231_p2 }
  0x29   :  { %1239 = shalt.err (!%p1236_p4)
}
  0x2a   :  { %s1240_s8 = scalar_lea.vmem %s48_s23, 2048  ;;  %p1245_p6 = scmp.lt.s32.totalorder %s48_s23, %s48_s23 }
  0x2b   :  { %p1241_p5 = scmp.ne.s32.totalorder %s48_s23, %s1240_s8  ;;  %p1246_p7 = scmp.lt.s32.totalorder %s1240_s8, %s1240_s8 }
  0x2d   :  { %p1247_p8 = por %p1246_p7, %p1245_p6 }
  0x2f   :  { %p1248_p9 = pnand %p1247_p8, %p1241_p5 }
  0x31   :  { %1251 = shalt.err (!%p1248_p9)
}
  0x32   :  { %s1285_s2 = smov 64   ;;  %s1286_s24 = smov 4  }
  0x33   :  { %53 = dma.hbm_to_vmem [thread:$0]  %s1416_s4, 2048, %s48_s23, [#allocation6], %s1285_s2, %s1285_s2, %s1286_s24  }
  0x34   :  { %1274 = dma.done.wait [#allocation3], 1664  }
  0x35   :  { %1275 = vsyncadd [#allocation3], 4294965632 }
  0x36   :  { %1276 = dma.done.wait [#allocation6], 10240  }
  0x37   :  { %1277 = vsyncadd [#allocation6], 4294957056  ;;  %v1287_v0 = vmov 0   ;;  %v1054_v1 = vld [vmem:[#allocation2 + $0x4] ss:$8 sps:$4 sm:$0xff]   ;;  %vm177_vm0 = vcmask 1041408  }
  0x38   :  { %216 = vmatprep.mubr.bf16.mxu0 %v1287_v0  ;;  %1053 = vset.pattern.permute.xlu0 %v1287_v0  ;;  %v1056_v2 = vld [vmem:[#allocation2] ss:$8 sps:$4 sm:$0xff]   ;;  %v1057_v3 = vld [vmem:[#allocation2 + $0x14] ss:$8 sps:$4 sm:$0xff]   ;;  %v1059_v4 = vld [vmem:[#allocation2 + $0x10] ss:$8 sps:$4 sm:$0xff]  }
  0x39   :  { %184 = vmatprep.subr.bf16.mxu0 %v1054_v1  ;;  %v1060_v5 = vld [vmem:[#allocation2 + $0x24] ss:$8 sps:$4 sm:$0xff]   ;;  %v1062_v6 = vld [vmem:[#allocation2 + $0x20] ss:$8 sps:$4 sm:$0xff]   ;;  %v1063_v7 = vld [vmem:[#allocation2 + $0x34] ss:$8 sps:$4 sm:$0xff]  }
  0x3a   :  { %185 = vmatpush1.bf16.msra.mxu0 %v1056_v2  ;;  %v67_v8 = vld [vmem:[%s1413_s1] sm:$0xff]  ;;  %v1074_v9 = vld [vmem:[#allocation5 + $0x4] ss:$8 sps:$4 sm:$0xff]   ;;  %v1076_v10 = vld [vmem:[#allocation5] ss:$8 sps:$4 sm:$0xff]   ;;  %vm173_vm1 = vcmask 818176  }
  0x3b   :  { %186 = vmatprep.subr.bf16.mxu0 %v1057_v3  ;;  %92 = vperm.xlu0 %1053, %v67_v8   ;;  %v1065_v11 = vld [vmem:[#allocation2 + $0x30] ss:$8 sps:$4 sm:$0xff]   ;;  %v1077_v12 = vld [vmem:[#allocation5 + $0x14] ss:$8 sps:$4 sm:$0xff]   ;;  %v1080_v15 = vld [vmem:[#allocation5 + $0x24] ss:$8 sps:$4 sm:$0xff]  }
  0x3c   :  { %445 = vmatprep.subr.bf16.mxu1 %v1074_v9  ;;  %v1066_v13 = vld [vmem:[#allocation2 + $0x44] ss:$8 sps:$4 sm:$0xff]   ;;  %v1079_v14 = vld [vmem:[#allocation5 + $0x10] ss:$8 sps:$4 sm:$0xff]   ;;  %v1069_v17 = vld [vmem:[#allocation2 + $0x54] ss:$8 sps:$4 sm:$0xff]  }
  0x3d   :  { %446 = vmatpush1.bf16.msra.mxu1 %v1076_v10  ;;  %v1068_v16 = vld [vmem:[#allocation2 + $0x40] ss:$8 sps:$4 sm:$0xff]   ;;  %v1083_v20 = vld [vmem:[#allocation5 + $0x34] ss:$8 sps:$4 sm:$0xff]   ;;  %v1071_v21 = vld [vmem:[#allocation2 + $0x50] ss:$8 sps:$4 sm:$0xff]  }
  0x3e   :  { %187 = vmatpush1.bf16.msra.mxu0 %v1059_v4  ;;  %447 = vmatprep.subr.bf16.mxu1 %v1077_v12  ;;  %v89_v18 = vld [vmem:[#allocation2 + $0x60] sm:$0x33]  ;;  %v1082_v19 = vld [vmem:[#allocation5 + $0x20] ss:$8 sps:$4 sm:$0xff]   ;;  %v1086_v25 = vld [vmem:[#allocation5 + $0x44] ss:$8 sps:$4 sm:$0xff]  }
  0x3f   :  { %188 = vmatprep.subr.bf16.mxu0 %v1060_v5  ;;  %v939_v22 = vcombine.high %v89_v18, %v89_v18  ;;  %v938_v23 = vcombine.low %v89_v18, %v89_v18  ;;  %v1085_v24 = vld [vmem:[#allocation5 + $0x30] ss:$8 sps:$4 sm:$0xff]   ;;  %v1088_v28 = vld [vmem:[#allocation5 + $0x40] ss:$8 sps:$4 sm:$0xff]   ;;  %v1089_v29 = vld [vmem:[#allocation5 + $0x54] ss:$8 sps:$4 sm:$0xff]  }
  0x40   :  { %v66_v26 = vld [vmem:[%s1412_s0] sm:$0xff]  ;;  %v1092_v32 = vld [vmem:[#allocation5 + $0x64] ss:$8 sps:$4 sm:$0xff]   ;;  %v1094_v33 = vld [vmem:[#allocation5 + $0x60] ss:$8 sps:$4 sm:$0xff]   ;;  %s1288_s21 = smov [#allocation8]  }
  0x41   :  { %448 = vmatpush1.bf16.msra.mxu1 %v1079_v14  ;;  %v179_v27 = vsel %vm177_vm0, %v938_v23, 0  ;;  %v76_v30 = vpack.c.bf16 %v66_v26, %v66_v26  ;;  %v1091_v31 = vld [vmem:[#allocation5 + $0x50] ss:$8 sps:$4 sm:$0xff]   ;;  %v1095_v34 = vld [vmem:[#allocation5 + $0x74] ss:$8 sps:$4 sm:$0xff]   ;;  %s913_s22 = sshll.u32 %s1288_s21, 4  ;;  %s914_s22 = int_to_ptr.vmem [resolvable:$true] %s913_s22 }
  0x42   :  { %189 = vmatpush1.bf16.msra.mxu0 %v1062_v6  ;;  %449 = vmatprep.subr.bf16.mxu1 %v1080_v15  ;;  %v1097_v35 = vld [vmem:[#allocation5 + $0x70] ss:$8 sps:$4 sm:$0xff]   ;;  %v1098_v36 = vld [vmem:[#allocation5 + $0x84] ss:$8 sps:$4 sm:$0xff]   ;;  %v1100_v37 = vld [vmem:[#allocation5 + $0x80] ss:$8 sps:$4 sm:$0xff]   ;;  %p1257_p11 = scmp.lt.s32.totalorder %s914_s22, %s914_s22 }
  0x43   :  { %190 = vmatprep.subr.bf16.mxu0 %v1063_v7  ;;  %v1101_v38 = vld [vmem:[#allocation5 + $0x94] ss:$8 sps:$4 sm:$0xff]   ;;  %v1103_v39 = vld [vmem:[#allocation5 + $0x90] ss:$8 sps:$4 sm:$0xff]   ;;  %v1104_v40 = vld [vmem:[#allocation5 + $0xa4] ss:$8 sps:$4 sm:$0xff]  }
  0x44   :  { %v1106_v41 = vld [vmem:[#allocation5 + $0xa0] ss:$8 sps:$4 sm:$0xff]   ;;  %v1107_v42 = vld [vmem:[#allocation5 + $0xb4] ss:$8 sps:$4 sm:$0xff]   ;;  %v1109_v43 = vld [vmem:[#allocation5 + $0xb0] ss:$8 sps:$4 sm:$0xff]  }
  0x45   :  { %450 = vmatpush1.bf16.msra.mxu1 %v1082_v19  ;;  %v1110_v44 = vld [vmem:[#allocation5 + $0xc4] ss:$8 sps:$4 sm:$0xff]   ;;  %v1112_v45 = vld [vmem:[#allocation5 + $0xc0] ss:$8 sps:$4 sm:$0xff]   ;;  %v1113_v46 = vld [vmem:[#allocation5 + $0xd4] ss:$8 sps:$4 sm:$0xff]  }
  0x46   :  { %191 = vmatpush1.bf16.msra.mxu0 %v1065_v11  ;;  %451 = vmatprep.subr.bf16.mxu1 %v1083_v20  ;;  %v1115_v47 = vld [vmem:[#allocation5 + $0xd0] ss:$8 sps:$4 sm:$0xff]   ;;  %v1116_v48 = vld [vmem:[#allocation5 + $0xe4] ss:$8 sps:$4 sm:$0xff]   ;;  %v1118_v49 = vld [vmem:[#allocation5 + $0xe0] ss:$8 sps:$4 sm:$0xff]  }
  0x47   :  { %192 = vmatprep.subr.bf16.mxu0 %v1066_v13  ;;  %v1119_v50 = vld [vmem:[#allocation5 + $0xf4] ss:$8 sps:$4 sm:$0xff]   ;;  %v1121_v51 = vld [vmem:[#allocation5 + $0xf0] ss:$8 sps:$4 sm:$0xff]   ;;  %v1122_v52 = vld [vmem:[#allocation5 + $0x100] ss:$8 sps:$4 sm:$0xff]  }
  0x48   :  { %v1124_v53 = vld [vmem:[#allocation5 + $0x104] ss:$8 sps:$4 sm:$0xff]   ;;  %v1127_v54 = vld [vmem:[#allocation5 + $0x114] ss:$8 sps:$4 sm:$0xff]   ;;  %v1125_v55 = vld [vmem:[#allocation5 + $0x110] ss:$8 sps:$4 sm:$0xff]  }
  0x49   :  { %452 = vmatpush1.bf16.msra.mxu1 %v1085_v24  ;;  %v1130_v56 = vld [vmem:[#allocation5 + $0x124] ss:$8 sps:$4 sm:$0xff]   ;;  %v1128_v57 = vld [vmem:[#allocation5 + $0x120] ss:$8 sps:$4 sm:$0xff]   ;;  %v1133_v58 = vld [vmem:[#allocation5 + $0x134] ss:$8 sps:$4 sm:$0xff]  }
  0x4a   :  { %193 = vmatpush1.bf16.msra.mxu0 %v1068_v16  ;;  %453 = vmatprep.subr.bf16.mxu1 %v1086_v25  ;;  %v1131_v59 = vld [vmem:[#allocation5 + $0x130] ss:$8 sps:$4 sm:$0xff]   ;;  %v1136_v60 = vld [vmem:[#allocation5 + $0x144] ss:$8 sps:$4 sm:$0xff]   ;;  %v1134_v61 = vld [vmem:[#allocation5 + $0x140] ss:$8 sps:$4 sm:$0xff]   ;;  %v96_v16 = vlaneseq }
  0x4b   :  { %194 = vmatprep.subr.bf16.mxu0 %v1069_v17  ;;  %v1139_v62 = vld [vmem:[#allocation5 + $0x154] ss:$8 sps:$4 sm:$0xff]   ;;  %v1137_v63 = vld [vmem:[#allocation5 + $0x150] ss:$8 sps:$4 sm:$0xff]   ;;  %v1142_v0 = vld [vmem:[#allocation5 + $0x164] ss:$8 sps:$4 sm:$0xff]  }
  0x4c   :  { %v1140_v1 = vld [vmem:[#allocation5 + $0x160] ss:$8 sps:$4 sm:$0xff]   ;;  %v1145_v2 = vld [vmem:[#allocation5 + $0x174] ss:$8 sps:$4 sm:$0xff]   ;;  %v1143_v3 = vld [vmem:[#allocation5 + $0x170] ss:$8 sps:$4 sm:$0xff]  }
  0x4d   :  { %454 = vmatpush1.bf16.msra.mxu1 %v1088_v28  ;;  %v1148_v4 = vld [vmem:[#allocation5 + $0x184] ss:$8 sps:$4 sm:$0xff]   ;;  %v1146_v5 = vld [vmem:[#allocation5 + $0x180] ss:$8 sps:$4 sm:$0xff]   ;;  %v1151_v6 = vld [vmem:[#allocation5 + $0x194] ss:$8 sps:$4 sm:$0xff]  }
  0x4e   :  { %195 = vmatpush1.bf16.msra.mxu0 %v1071_v21  ;;  %455 = vmatprep.subr.bf16.mxu1 %v1089_v29  ;;  %v1149_v7 = vld [vmem:[#allocation5 + $0x190] ss:$8 sps:$4 sm:$0xff]   ;;  %v1154_v8 = vld [vmem:[#allocation5 + $0x1a4] ss:$8 sps:$4 sm:$0xff]   ;;  %v1152_v9 = vld [vmem:[#allocation5 + $0x1a0] ss:$8 sps:$4 sm:$0xff]  }
  0x4f   :  { %940 = vmatprep.subr.msk.bf16.mxu0 %vm177_vm0, %v939_v22  ;;  %v1157_v10 = vld [vmem:[#allocation5 + $0x1b4] ss:$8 sps:$4 sm:$0xff]   ;;  %v1155_v11 = vld [vmem:[#allocation5 + $0x1b0] ss:$8 sps:$4 sm:$0xff]   ;;  %v1160_v12 = vld [vmem:[#allocation5 + $0x1c4] ss:$8 sps:$4 sm:$0xff]  }
  0x50   :  { %v1158_v13 = vld [vmem:[#allocation5 + $0x1c0] ss:$8 sps:$4 sm:$0xff]   ;;  %v1163_v14 = vld [vmem:[#allocation5 + $0x1d4] ss:$8 sps:$4 sm:$0xff]   ;;  %v1161_v15 = vld [vmem:[#allocation5 + $0x1d0] ss:$8 sps:$4 sm:$0xff]  }
  0x51   :  { %456 = vmatpush1.bf16.msra.mxu1 %v1091_v31  ;;  %v97_v17 = vshrl.u32 %v96_v16, 7  ;;  %v925_v19 = vld [vmem:[%s1417_s5 + $0x4] ss:$8 sm:$0x3]  ;;  %s1252_s23 = scalar_lea.vmem %s914_s22, 128 }
  0x52   :  { %197 = vmatpush1.bf16.msra.mxu0 %v179_v27  ;;  %457 = vmatprep.subr.bf16.mxu1 %v1092_v32  ;;  %v68_v24 = vld [vmem:[%s1417_s5] ss:$8 sm:$0x3]  ;;  %p1253_p10 = scmp.ne.s32.totalorder %s914_s22, %s1252_s23  ;;  %p1258_p12 = scmp.lt.s32.totalorder %s1252_s23, %s1252_s23 }
  0x53   :  { %693 = vmatprep.subr.bf16.mxu0 %v1124_v53  ;;  %v1373_v18 = vsub.s32 0, %v97_v17  ;;  %v1378_v20 = vsub.s32 1, %v97_v17  ;;  %v1178_v53 = vld [vmem:[#allocation7 + $0x60] sm:$0xff]  }
  0x54   :  { %p1259_p13 = por %p1258_p12, %p1257_p11 }
  0x55   :  { %941 = vmatmul.mubr.msk.bf16.vlgmr.msra.gmra.mrb[0].mxu0 %vm173_vm1, %v76_v30  ;;  %458 = vmatpush1.bf16.msra.mxu1 %v1094_v33  ;;  %v99_v21 = vrot.slane %v925_v19, %v1373_v18  ;;  %v103_v22 = vrot.slane %v925_v19, %v1378_v20  ;;  %v229_v27 = vrot.slane %v68_v24, %v1373_v18 }
  0x56   :  { %459 = vmatprep.subr.bf16.mxu1 %v1095_v34  ;;  %694 = vmatpush1.bf16.msra.mxu0 %v1122_v52  ;;  %v233_v29 = vrot.slane %v68_v24, %v1378_v20  ;;  %v1177_v52 = vld [vmem:[#allocation7 + $0x18] sm:$0xff]   ;;  %p1260_p0 = pnand %p1259_p13, %p1253_p10 }
  0x57   :  { %695 = vmatprep.subr.bf16.mxu0 %v1127_v54  ;;  %v1179_v54 = vld [vmem:[#allocation7 + $0x20] sm:$0xff]  }
  0x59   :  { %460 = vmatpush1.bf16.msra.mxu1 %v1097_v35 }
  0x5a   :  { %461 = vmatprep.subr.bf16.mxu1 %v1098_v36  ;;  %696 = vmatpush1.bf16.msra.mxu0 %v1125_v55  ;;  %v1180_v55 = vld [vmem:[#allocation7 + $0x68] sm:$0xff]  }
  0x5b   :  { %697 = vmatprep.subr.bf16.mxu0 %v1130_v56  ;;  %v1181_v56 = vld [vmem:[#allocation7 + $0x28] sm:$0xff]  }
  0x5d   :  { %462 = vmatpush1.bf16.msra.mxu1 %v1100_v37 }
  0x5e   :  { %463 = vmatprep.subr.bf16.mxu1 %v1101_v38  ;;  %698 = vmatpush1.bf16.msra.mxu0 %v1128_v57  ;;  %v923_v57 = vld [vmem:[%s1417_s5 + $0x1] ss:$8 sm:$0x3] }
  0x5f   :  { %699 = vmatprep.subr.bf16.mxu0 %v1133_v58  ;;  %v278_v58 = vrot.slane %v923_v57, %v1373_v18 }
  0x61   :  { %464 = vmatpush1.bf16.msra.mxu1 %v1103_v39 }
  0x62   :  { %465 = vmatprep.subr.bf16.mxu1 %v1104_v40  ;;  %700 = vmatpush1.bf16.msra.mxu0 %v1131_v59  ;;  %v282_v59 = vrot.slane %v923_v57, %v1378_v20 }
  0x63   :  { %701 = vmatprep.subr.bf16.mxu0 %v1136_v60 }
  0x65   :  { %466 = vmatpush1.bf16.msra.mxu1 %v1106_v41  ;;  %v1166_v41 = vld [vmem:[#allocation5 + $0x1e4] ss:$8 sps:$4 sm:$0xff]  }
  0x66   :  { %467 = vmatprep.subr.bf16.mxu1 %v1107_v42  ;;  %702 = vmatpush1.bf16.msra.mxu0 %v1134_v61  ;;  %v1164_v42 = vld [vmem:[#allocation5 + $0x1e0] ss:$8 sps:$4 sm:$0xff]  }
  0x67   :  { %703 = vmatprep.subr.bf16.mxu0 %v1139_v62 }
  0x69   :  { %468 = vmatpush1.bf16.msra.mxu1 %v1109_v43  ;;  %v1169_v43 = vld [vmem:[#allocation5 + $0x1f4] ss:$8 sps:$4 sm:$0xff]  }
  0x6a   :  { %469 = vmatprep.subr.bf16.mxu1 %v1110_v44  ;;  %704 = vmatpush1.bf16.msra.mxu0 %v1137_v63  ;;  %v1167_v44 = vld [vmem:[#allocation5 + $0x1f0] ss:$8 sps:$4 sm:$0xff]  }
  0x6b   :  { %705 = vmatprep.subr.bf16.mxu0 %v1142_v0 }
  0x6d   :  { %470 = vmatpush1.bf16.msra.mxu1 %v1112_v45  ;;  %v1170_v45 = vld [vmem:[#allocation7 + $0x40] sm:$0xff]  }
  0x6e   :  { %471 = vmatprep.subr.bf16.mxu1 %v1113_v46  ;;  %706 = vmatpush1.bf16.msra.mxu0 %v1140_v1  ;;  %v1171_v46 = vld [vmem:[#allocation7] sm:$0xff]  }
  0x6f   :  { %707 = vmatprep.subr.bf16.mxu0 %v1145_v2 }
  0x71   :  { %472 = vmatpush1.bf16.msra.mxu1 %v1115_v47  ;;  %v1172_v47 = vld [vmem:[#allocation7 + $0x48] sm:$0xff]  }
  0x72   :  { %473 = vmatprep.subr.bf16.mxu1 %v1116_v48  ;;  %708 = vmatpush1.bf16.msra.mxu0 %v1143_v3  ;;  %v1173_v48 = vld [vmem:[#allocation7 + $0x8] sm:$0xff]  }
  0x73   :  { %709 = vmatprep.subr.bf16.mxu0 %v1148_v4 }
  0x75   :  { %474 = vmatpush1.bf16.msra.mxu1 %v1118_v49  ;;  %v1174_v49 = vld [vmem:[#allocation7 + $0x50] sm:$0xff]  }
  0x76   :  { %475 = vmatprep.subr.bf16.mxu1 %v1119_v50  ;;  %710 = vmatpush1.bf16.msra.mxu0 %v1146_v5  ;;  %v1175_v50 = vld [vmem:[#allocation7 + $0x10] sm:$0xff]  }
  0x77   :  { %711 = vmatprep.subr.bf16.mxu0 %v1151_v6  ;;  %v1182_v6 = vld [vmem:[#allocation7 + $0x70] sm:$0xff]  }
  0x79   :  { %476 = vmatpush1.bf16.msra.mxu1 %v1121_v51  ;;  %v1176_v51 = vld [vmem:[#allocation7 + $0x58] sm:$0xff]  }
  0x7a   :  { %712 = vmatpush1.bf16.msra.mxu0 %v1149_v7  ;;  %1022 = vmatprep.subr.bf16.mxu1 %v1170_v45  ;;  %v1183_v7 = vld [vmem:[#allocation7 + $0x30] sm:$0xff]  }
  0x7b   :  { %713 = vmatprep.subr.bf16.mxu0 %v1154_v8  ;;  %v1184_v8 = vld [vmem:[#allocation7 + $0x78] sm:$0xff]  }
  0x7e   :  { %714 = vmatpush1.bf16.msra.mxu0 %v1152_v9  ;;  %v1185_v9 = vld [vmem:[#allocation7 + $0x38] sm:$0xff]  }
  0x7f   :  { %715 = vmatprep.subr.bf16.mxu0 %v1157_v10  ;;  %v924_v10 = vld [vmem:[%s1417_s5 + $0x2] ss:$8 sm:$0x3] }
  0x82   :  { %716 = vmatpush1.bf16.msra.mxu0 %v1155_v11  ;;  %v526_v11 = vrot.slane %v924_v10, %v1373_v18 }
  0x83   :  { %717 = vmatprep.subr.bf16.mxu0 %v1160_v12  ;;  %v530_v12 = vrot.slane %v924_v10, %v1378_v20 }
  0x86   :  { %718 = vmatpush1.bf16.msra.mxu0 %v1158_v13 }
  0x87   :  { %719 = vmatprep.subr.bf16.mxu0 %v1163_v14 }
  0x8a   :  { %720 = vmatpush1.bf16.msra.mxu0 %v1161_v15 }
  0x8b   :  { %721 = vmatprep.subr.bf16.mxu0 %v1166_v41 }
  0x8e   :  { %722 = vmatpush1.bf16.msra.mxu0 %v1164_v42 }
  0x8f   :  { %723 = vmatprep.subr.bf16.mxu0 %v1169_v43 }
  0x92   :  { %724 = vmatpush1.bf16.msra.mxu0 %v1167_v44 }
  0xba   :  { %v93_v23 = vpop.permute.xlu0 %92 }
  0xbb   :  { %v106_v25 = vmul.f32 %v99_v21, %v93_v23  ;;  %v107_v26 = vmul.f32 %v103_v22, %v93_v23 }
 0x128   :  { %v218_v28 = vpop.f32.mrb[0].mxu0 }
 0x129   :  { %v219_v30 = vadd.f32 %v218_v28, %v106_v25  ;;  %v220_v31 = vpop.f32.mrb[1].mxu0 }
 0x12a   :  { %v221_v32 = vadd.f32 %v220_v31, %v107_v26  ;;  %v222_v33 = vpop.f32.mrb[2].mxu0  ;;  %v73_v26 = vld [vmem:[%s1417_s5 + $0x3] ss:$0 sm:$0xff] }
 0x12b   :  { %v236_v34 = vadd.f32 %v229_v27, %v219_v30  ;;  %v223_v35 = vpop.f32.mrb[3].mxu0 }
 0x12c   :  { %v237_v36 = vadd.f32 %v233_v29, %v221_v32 }
 0x12d   :  { %v238_v37 = vmax.f32 %v236_v34, 0.0 }
 0x12e   :  { %v239_v38 = vmax.f32 %v237_v36, 0.0 }
 0x12f   :  { %v240_v40 = vpack.c.bf16 %v238_v37, %v238_v37 }
 0x130   :  { %v241_v39 = vpack.c.bf16 %v239_v38, %v239_v38 }
 0x132   :  { %477 = vmatprep.mubr.bf16.mxu1 %v241_v39 }
 0x133   :  { %478 = vmatmul.mubr.bf16.vlgmr.msra.gmra.mrb[0].mxu1 %v240_v40 }
 0x134   :  { %1023 = vmatpush3.bf16.msra.mxu1 %v1171_v46 }
 0x135   :  { %1024 = vmatprep.subr.bf16.mxu1 %v1172_v47 }
 0x138   :  { %1025 = vmatpush3.bf16.msra.mxu1 %v1173_v48 }
 0x139   :  { %1026 = vmatprep.subr.bf16.mxu1 %v1174_v49 }
 0x13c   :  { %1027 = vmatpush3.bf16.msra.mxu1 %v1175_v50 }
 0x13d   :  { %1028 = vmatprep.subr.bf16.mxu1 %v1176_v51 }
 0x140   :  { %1029 = vmatpush3.bf16.msra.mxu1 %v1177_v52 }
 0x141   :  { %1030 = vmatprep.subr.bf16.mxu1 %v1178_v53 }
 0x144   :  { %1031 = vmatpush3.bf16.msra.mxu1 %v1179_v54 }
 0x145   :  { %1032 = vmatprep.subr.bf16.mxu1 %v1180_v55 }
 0x148   :  { %1033 = vmatpush3.bf16.msra.mxu1 %v1181_v56 }
 0x149   :  { %1034 = vmatprep.subr.bf16.mxu1 %v1182_v6 }
 0x14c   :  { %1035 = vmatpush3.bf16.msra.mxu1 %v1183_v7 }
 0x14d   :  { %1036 = vmatprep.subr.bf16.mxu1 %v1184_v8 }
 0x150   :  { %1037 = vmatpush3.bf16.msra.mxu1 %v1185_v9 }
 0x206   :  { %v479_v60 = vpop.f32.mrb[0].mxu1 }
 0x207   :  { %v480_v61 = vadd.f32 %v479_v60, %v278_v58  ;;  %v481_v62 = vpop.f32.mrb[1].mxu1 }
 0x208   :  { %v482_v63 = vadd.f32 %v481_v62, %v282_v59  ;;  %v483_v0 = vpop.f32.mrb[2].mxu1 }
 0x209   :  { %v486_v1 = vmax.f32 %v480_v61, 0.0  ;;  %v484_v2 = vpop.f32.mrb[3].mxu1 }
 0x20a   :  { %v487_v3 = vmax.f32 %v482_v63, 0.0 }
 0x20b   :  { %v488_v5 = vpack.c.bf16 %v486_v1, %v486_v1 }
 0x20c   :  { %v489_v4 = vpack.c.bf16 %v487_v3, %v487_v3 }
 0x20e   :  { %725 = vmatprep.mubr.bf16.mxu0 %v489_v4 }
 0x20f   :  { %726 = vmatmul.mubr.bf16.vlgmr.msra.gmra.mrb[4].mxu0 %v488_v5 }
 0x2e2   :  { %v727_v13 = vpop.f32.mrb[4].mxu0 }
 0x2e3   :  { %v728_v14 = vadd.f32 %v727_v13, %v526_v11  ;;  %v729_v15 = vpop.f32.mrb[5].mxu0 }
 0x2e4   :  { %v730_v16 = vadd.f32 %v729_v15, %v530_v12  ;;  %v731_v17 = vpop.f32.mrb[6].mxu0 }
 0x2e5   :  { %v734_v19 = vmax.f32 %v728_v14, 0.0  ;;  %v732_v21 = vpop.f32.mrb[7].mxu0 }
 0x2e6   :  { %v735_v22 = vmax.f32 %v730_v16, 0.0 }
 0x2e7   :  { %v736_v24 = vpack.c.bf16 %v734_v19, %v734_v19 }
 0x2e8   :  { %v737_v23 = vpack.c.bf16 %v735_v22, %v735_v22 }
 0x2ea   :  { %898 = vmatprep.mubr.bf16.mxu1 %v737_v23 }
 0x2eb   :  { %899 = vmatmul.mubr.bf16.vlgmr.msra.gmra.mrb[4].mxu1 %v736_v24 }
 0x3be   :  { %v1038_v25 = vpop.f32.mrb[4].mxu1 }
 0x3bf   :  { %v1039_v18 = vpop.f32.mrb[5].mxu1 }
 0x3c0   :  { %v1040_v20 = vadd.f32 %v1039_v18, %v1038_v25  ;;  %v1041_v27 = vpop.f32.mrb[6].mxu1 }
 0x3c1   :  { %v1042_v28 = vpop.f32.mrb[7].mxu1 }
 0x3c2   :  { %v901_v29 = vadd.f32 %v1040_v20, %v73_v26 }
 0x3c4   :  { %906 = vst [vmem:[#allocation8] sm:$0xff] %v901_v29 }
 0x3c5   :  { %1263 = shalt.err (!%p1260_p0)
}
 0x3c6   :  { %s1264_s5 = scalar_lea.hbm %s1418_s6, 128 }
 0x3c7   :  { %p1265_p1 = scmp.ne.s32.totalorder %s1418_s6, %s1264_s5  ;;  %p1268_p2 = scmp.lt.u32.totalorder %s1264_s5, %s1418_s6 }
 0x3c9   :  { %p1270_p3 = pnand %p1268_p2, %p1265_p1 }
 0x3cb   :  { %1273 = shalt.err (!%p1270_p3)
}
 0x3cc   :  { %916 = dma.vmem_to_hbm [thread:$0]  %s914_s22, 128, %s1418_s6, [#allocation4]  }
 0x3cd   :  { %1278 = dma.done.wait [#allocation4], 128  }
 0x3ce   :  { %1279 = vsyncadd [#allocation4], 4294967168 }
 0x3cf   :  { %920 = vsyncpa [#allocation3], 1 }
 0x3d0   :  { %921 = vsyncpa [#allocation6], 1 }
 0x3d1   :  { %922 = vsyncpa [#allocation4], 1 }

</bundles_post_ra>
